<compile_context>
chip_gen: v5e
topology: v5e:2x2
jax: 0.10.0
libtpu: 0.0.40
codegen_flags: <defaults>
</compile_context>

<pallas_src>
import jax
import jax.numpy as jnp
from jax.experimental import pallas as pl
from jax.experimental.pallas import tpu as pltpu


def _gat_kernel(node_ref, nb_ref, wpack_ref, wbig_ref, mask_ref, out_ref):
    tm, F = node_ref.shape
    KF = nb_ref.shape[1]
    K = KF // F

    nb = nb_ref[...]                                  # (tm, K*F)  input dtype
    node = node_ref[...].astype(jnp.float32)          # (tm, F)    f32 for score math
    w1 = wpack_ref[0:1, :]                            # (1, F)     f32
    bias = wpack_ref[1:2, 0:1]                        # (1, 1)     f32

    # node-half score + bias (constant over k; cancels in softmax, kept for
    # structural faithfulness to the module)
    s_node = jnp.sum(node * w1, axis=-1, keepdims=True) + bias          # (tm, 1)

    # neighbor-half scores for all k in ONE native bf16 MXU pass against the
    # resident block-diagonal weight (columns >= K are zero), f32 accumulation.
    s_nb = jnp.dot(nb.astype(jnp.bfloat16), wbig_ref[...],
                   preferred_element_type=jnp.float32)                  # (tm, KP)

    # precomputed additive lane mask: 0 for k < K, -1e30 for padded lanes.
    scores = s_nb + s_node + mask_ref[0:1, :]                           # (tm, KP)

    # numerically stable softmax over the K valid lanes (f32 throughout)
    m = jnp.max(scores, axis=-1, keepdims=True)                         # (tm, 1)
    e = jnp.exp(scores - m)                    # padded lanes underflow to 0
    l = jnp.sum(e, axis=-1, keepdims=True)                              # (tm, 1)

    # un-normalized weighted neighbor sum; static K -> fully unrolled, each
    # step a cheap lane-broadcast multiply-add on a lane-tile slice.
    acc = jnp.zeros((tm, F), jnp.float32)
    for k in range(K):
        acc = acc + e[:, k:k + 1] * nb[:, k * F:(k + 1) * F].astype(jnp.float32)

    # deferred normalization: one (tm,1) reciprocal instead of a (tm,K) divide.
    inv_l = pl.reciprocal(l, approx=False)     # approx=True if ~1e-3 is enough
    out_ref[...] = (acc * inv_l).astype(out_ref.dtype)


def _vmem_caps():
    """(tile budget, vmem_limit, min grid steps) — conservative defaults are
    safe for v7x (64 MiB physical / 32 MiB scoped per TC); v5e/v6e (128 MiB)
    get a larger tile budget and fewer required grid steps."""
    budget, limit, min_steps = 24 << 20, 32 << 20, 4
    try:
        cap = int(getattr(pltpu.get_tpu_info(), "vmem_capacity_bytes", 0) or 0)
        if cap >= (96 << 20):                  # v5e / v6e class VMEM
            budget, limit, min_steps = 40 << 20, 48 << 20, 2
    except Exception:
        pass
    return budget, limit, min_steps


def _choose_row_tile(M, K, F, KP, in_itemsize, out_itemsize, w_itemsize,
                     *, budget_bytes, min_grid_steps):
    """Row tile from the double-buffered VMEM footprint, including residents."""
    # streaming bytes per row (node + neighbors in, out), double-buffered
    row_bytes = 2 * ((K * F + F) * in_itemsize + F * out_itemsize)
    # resident operands: block-diag weight (bf16), wpack, mask (double buffers)
    resident = 2 * (K * F * KP * w_itemsize + 8 * F * 4 + 8 * KP * 4)
    avail = max(budget_bytes - resident, 16 * row_bytes)
    target = 1024 if budget_bytes >= (32 << 20) else 512
    tm = min(target, avail // row_bytes)
    tm = max(8, (tm // 8) * 8)                         # sublane multiple
    cap = (M // 8) * 8 if M >= 8 else 8                # don't exceed the problem
    tm = min(tm, cap)
    # keep a few grid steps for pipelining / megacore, but never shrink tiles
    # below 256 rows (achieved HBM roofline fraction drops fast below that).
    while tm > 256 and pl.cdiv(M, tm) < min_grid_steps:
        tm //= 2
    return max(8, (tm // 8) * 8)


def graph_attention_head(node_features, neighbor_features, weight, bias, *, tm=None):
    """node_features: (B,N,F); neighbor_features: (B,N,K,F);
    weight: (1, 2F) (nn.Linear(2F,1).weight); bias: (1,)."""
    B, N, F = node_features.shape
    K = neighbor_features.shape[2]
    M = B * N
    in_dtype = node_features.dtype

    KP = max(128, pl.cdiv(K, 128) * 128)               # padded score-lane width

    budget, vmem_limit, min_steps = _vmem_caps()
    itemsize = jnp.dtype(in_dtype).itemsize
    if tm is None:
        tm = _choose_row_tile(M, K, F, KP, itemsize, itemsize, 2,
                              budget_bytes=budget, min_grid_steps=min_steps)
    assert tm % 8 == 0 and tm > 0

    # free reshapes (no data movement, no dtype change): rows = flattened (B,N)
    node2 = node_features.reshape(M, F)
    nb_flat = neighbor_features.reshape(M, K * F)

    w1 = weight[0, :F].astype(jnp.float32)             # (F,) node half
    w2 = weight[0, F:].astype(jnp.float32)             # (F,) neighbor half

    # small resident operands:
    #   wpack row 0 = w1, row 1 = bias (f32, tiny)
    wpack = (jnp.zeros((8, F), jnp.float32)
             .at[0, :].set(w1)
             .at[1, :].set(bias[0].astype(jnp.float32)))
    #   block-diagonal neighbor weight for the MXU score matmul, stored bf16:
    #     wbig[k*F + f, k] = w2[f];  output lanes padded to KP.
    eye = jnp.eye(K, KP, dtype=jnp.float32)                              # (K, KP)
    wbig = (w2[None, :, None] * eye[:, None, :]).reshape(K * F, KP)
    wbig = wbig.astype(jnp.bfloat16)
    #   additive lane mask (0 for k < K, -1e30 otherwise), f32
    lane = jnp.arange(KP)
    mask = jnp.broadcast_to(
        jnp.where(lane < K, 0.0, -1e30).astype(jnp.float32)[None, :], (8, KP))

    out = pl.pallas_call(
        _gat_kernel,
        out_shape=jax.ShapeDtypeStruct((M, F), in_dtype),
        grid_spec=pltpu.PrefetchScalarGridSpec(
            num_scalar_prefetch=0,
            grid=(pl.cdiv(M, tm),),                    # partial last block OK
            in_specs=[
                pl.BlockSpec((tm, F), lambda i: (i, 0)),        # node rows
                pl.BlockSpec((tm, K * F), lambda i: (i, 0)),    # neighbors, lane-dense
                pl.BlockSpec((8, F), lambda i: (0, 0)),         # w1 + bias (resident)
                pl.BlockSpec((K * F, KP), lambda i: (0, 0)),    # block-diag w2 (resident)
                pl.BlockSpec((8, KP), lambda i: (0, 0)),        # additive lane mask
            ],
            out_specs=pl.BlockSpec((tm, F), lambda i: (i, 0)),
        ),
        compiler_params=pltpu.CompilerParams(
            dimension_semantics=("parallel",),
            vmem_limit_bytes=vmem_limit,
        ),
    )(node2, nb_flat, wpack, wbig, mask)

    return out.reshape(B, N, F)


def _reference(node_features, neighbor_features, weight, bias):
    """Pure-JAX reference mirroring the PyTorch forward exactly (elementwise
    f32 math, no matmul, so independent of TPU matmul precision)."""
    node_exp = jnp.broadcast_to(node_features[:, :, None, :], neighbor_features.shape)
    combined = jnp.concatenate([node_exp, neighbor_features], axis=-1)   # (B,N,K,2F)
    scores = jnp.sum(combined * weight[0], axis=-1) + bias[0]            # (B,N,K)
    attn = jax.nn.softmax(scores, axis=-1)
    return jnp.sum(neighbor_features * attn[..., None], axis=2)


if __name__ == "__main__":
    # N=10 deliberately makes M=20 not a multiple of the row tile so the
    # no-pad / partial-last-block path is exercised.
    B, N, K, F = 2, 10, 8, 128   # batch, nodes, neighbors-per-node, feature_dim

    key = jax.random.PRNGKey(0)
    k_node, k_nb, k_w, k_b = jax.random.split(key, 4)

    node_features = jax.random.normal(k_node, (B, N, F), dtype=jnp.float32)
    neighbor_features = jax.random.normal(k_nb, (B, N, K, F), dtype=jnp.float32)

    # nn.Linear(2F, 1): weight (1, 2F), bias (1,) — deterministic uniform init.
    bound = 1.0 / (2 * F) ** 0.5
    weight = jax.random.uniform(k_w, (1, 2 * F), jnp.float32, -bound, bound)
    bias = jax.random.uniform(k_b, (1,), jnp.float32, -bound, bound)

    out = graph_attention_head(node_features, neighbor_features, weight, bias)
    out = jax.block_until_ready(out)

    ref = _reference(node_features, neighbor_features, weight, bias)
    assert out.shape == (B, N, F)
    # Tolerance reflects the single-pass bf16 MXU score matmul (~1e-3 relative
    # score error, which the softmax / weighted sum tolerate).
    assert jnp.allclose(out, ref, rtol=5e-3, atol=5e-3), "mismatch vs reference"
    assert bool(jnp.all(jnp.isfinite(out))), "non-finite output"

    print("KERNEL_OK")
</pallas_src>

<mosaic_0001>
module attributes {stable_mosaic.version = 11 : i64} {
  func.func @_gat_kernel(%arg0: i32, %arg1: memref<16x128xf32, #tpu.memory_space<vmem>>, %arg2: memref<16x1024xf32, #tpu.memory_space<vmem>>, %arg3: memref<8x128xf32, #tpu.memory_space<vmem>>, %arg4: memref<1024x128xbf16, #tpu.memory_space<vmem>>, %arg5: memref<8x128xf32, #tpu.memory_space<vmem>>, %arg6: memref<16x128xf32, #tpu.memory_space<vmem>>) attributes {dimension_semantics = [#tpu.dimension_semantics<parallel>], iteration_bounds = array<i64: 2>, scalar_prefetch = 0 : i64, scratch_operands = 0 : i64, tpu.core_type = #tpu.core_type<tc>, window_params = [{transform_indices = @transform_0, window_bounds = array<i64: 16, 128>}, {transform_indices = @transform_1, window_bounds = array<i64: 16, 1024>}, {pipeline_mode = #tpu.pipeline_mode<synchronous>, transform_indices = @transform_2, window_bounds = array<i64: 8, 128>}, {pipeline_mode = #tpu.pipeline_mode<synchronous>, transform_indices = @transform_3, window_bounds = array<i64: 1024, 128>}, {pipeline_mode = #tpu.pipeline_mode<synchronous>, transform_indices = @transform_4, window_bounds = array<i64: 8, 128>}, {transform_indices = @transform_5, window_bounds = array<i64: 16, 128>}]} {
    %c0 = arith.constant 0 : index
    %c0_0 = arith.constant 0 : index
    %0 = vector.load %arg2[%c0, %c0_0] : memref<16x1024xf32, #tpu.memory_space<vmem>>, vector<16x1024xf32>
    %c0_1 = arith.constant 0 : index
    %c0_2 = arith.constant 0 : index
    %1 = vector.load %arg1[%c0_1, %c0_2] : memref<16x128xf32, #tpu.memory_space<vmem>>, vector<16x128xf32>
    %c0_3 = arith.constant 0 : index
    %c0_4 = arith.constant 0 : index
    %2 = vector.load %arg3[%c0_3, %c0_4] : memref<8x128xf32, #tpu.memory_space<vmem>>, vector<1x128xf32>
    %c1 = arith.constant 1 : index
    %c0_5 = arith.constant 0 : index
    %3 = vector.load %arg3[%c1, %c0_5] : memref<8x128xf32, #tpu.memory_space<vmem>>, vector<1x1xf32>
    %4 = vector.broadcast %2 : vector<1x128xf32> to vector<16x128xf32>
    %5 = arith.mulf %1, %4 : vector<16x128xf32>
    %cst = arith.constant dense<0.000000e+00> : vector<16xf32>
    %6 = vector.multi_reduction <add>, %5, %cst [1] : vector<16x128xf32> to vector<16xf32>
    %7 = vector.shape_cast %6 : vector<16xf32> to vector<16x1xf32>
    %8 = vector.broadcast %3 : vector<1x1xf32> to vector<16x1xf32>
    %9 = arith.addf %7, %8 : vector<16x1xf32>
    %10 = arith.truncf %0 : vector<16x1024xf32> to vector<16x1024xbf16>
    %c0_6 = arith.constant 0 : index
    %c0_7 = arith.constant 0 : index
    %11 = vector.load %arg4[%c0_6, %c0_7] : memref<1024x128xbf16, #tpu.memory_space<vmem>>, vector<1024x128xbf16>
    %cst_8 = arith.constant dense<0.000000e+00> : vector<16x128xf32>
    %12 = tpu.matmul %10, %11, %cst_8 {dimension_numbers = #tpu.dot_dimension_numbers<[1], [0], [0], [1], [0, 0, 1, 1], [], []>} : vector<16x1024xbf16>, vector<1024x128xbf16>, vector<16x128xf32> -> vector<16x128xf32>
    %13 = vector.broadcast %9 : vector<16x1xf32> to vector<16x128xf32>
    %14 = arith.addf %12, %13 : vector<16x128xf32>
    %c0_9 = arith.constant 0 : index
    %c0_10 = arith.constant 0 : index
    %15 = vector.load %arg5[%c0_9, %c0_10] : memref<8x128xf32, #tpu.memory_space<vmem>>, vector<1x128xf32>
    %16 = vector.broadcast %15 : vector<1x128xf32> to vector<16x128xf32>
    %17 = arith.addf %14, %16 : vector<16x128xf32>
    %cst_11 = arith.constant dense<0xFF800000> : vector<16xf32>
    %18 = vector.multi_reduction <maximumf>, %17, %cst_11 [1] : vector<16x128xf32> to vector<16xf32>
    %19 = vector.shape_cast %18 : vector<16xf32> to vector<16x1xf32>
    %20 = vector.broadcast %19 : vector<16x1xf32> to vector<16x128xf32>
    %21 = arith.subf %17, %20 : vector<16x128xf32>
    %22 = math.exp %21 : vector<16x128xf32>
    %cst_12 = arith.constant dense<0.000000e+00> : vector<16xf32>
    %23 = vector.multi_reduction <add>, %22, %cst_12 [1] : vector<16x128xf32> to vector<16xf32>
    %24 = vector.shape_cast %23 : vector<16xf32> to vector<16x1xf32>
    %cst_13 = arith.constant 0.000000e+00 : f32
    %25 = vector.broadcast %cst_13 : f32 to vector<16x128xf32>
    %26 = vector.extract_strided_slice %22 {offsets = [0, 0], sizes = [16, 1], strides = [1, 1]} : vector<16x128xf32> to vector<16x1xf32>
    %27 = vector.extract_strided_slice %0 {offsets = [0, 0], sizes = [16, 128], strides = [1, 1]} : vector<16x1024xf32> to vector<16x128xf32>
    %28 = vector.broadcast %26 : vector<16x1xf32> to vector<16x128xf32>
    %29 = arith.mulf %28, %27 : vector<16x128xf32>
    %30 = arith.addf %25, %29 : vector<16x128xf32>
    %31 = vector.extract_strided_slice %22 {offsets = [0, 1], sizes = [16, 1], strides = [1, 1]} : vector<16x128xf32> to vector<16x1xf32>
    %32 = vector.extract_strided_slice %0 {offsets = [0, 128], sizes = [16, 128], strides = [1, 1]} : vector<16x1024xf32> to vector<16x128xf32>
    %33 = vector.broadcast %31 : vector<16x1xf32> to vector<16x128xf32>
    %34 = arith.mulf %33, %32 : vector<16x128xf32>
    %35 = arith.addf %30, %34 : vector<16x128xf32>
    %36 = vector.extract_strided_slice %22 {offsets = [0, 2], sizes = [16, 1], strides = [1, 1]} : vector<16x128xf32> to vector<16x1xf32>
    %37 = vector.extract_strided_slice %0 {offsets = [0, 256], sizes = [16, 128], strides = [1, 1]} : vector<16x1024xf32> to vector<16x128xf32>
    %38 = vector.broadcast %36 : vector<16x1xf32> to vector<16x128xf32>
    %39 = arith.mulf %38, %37 : vector<16x128xf32>
    %40 = arith.addf %35, %39 : vector<16x128xf32>
    %41 = vector.extract_strided_slice %22 {offsets = [0, 3], sizes = [16, 1], strides = [1, 1]} : vector<16x128xf32> to vector<16x1xf32>
    %42 = vector.extract_strided_slice %0 {offsets = [0, 384], sizes = [16, 128], strides = [1, 1]} : vector<16x1024xf32> to vector<16x128xf32>
    %43 = vector.broadcast %41 : vector<16x1xf32> to vector<16x128xf32>
    %44 = arith.mulf %43, %42 : vector<16x128xf32>
    %45 = arith.addf %40, %44 : vector<16x128xf32>
    %46 = vector.extract_strided_slice %22 {offsets = [0, 4], sizes = [16, 1], strides = [1, 1]} : vector<16x128xf32> to vector<16x1xf32>
    %47 = vector.extract_strided_slice %0 {offsets = [0, 512], sizes = [16, 128], strides = [1, 1]} : vector<16x1024xf32> to vector<16x128xf32>
    %48 = vector.broadcast %46 : vector<16x1xf32> to vector<16x128xf32>
    %49 = arith.mulf %48, %47 : vector<16x128xf32>
    %50 = arith.addf %45, %49 : vector<16x128xf32>
    %51 = vector.extract_strided_slice %22 {offsets = [0, 5], sizes = [16, 1], strides = [1, 1]} : vector<16x128xf32> to vector<16x1xf32>
    %52 = vector.extract_strided_slice %0 {offsets = [0, 640], sizes = [16, 128], strides = [1, 1]} : vector<16x1024xf32> to vector<16x128xf32>
    %53 = vector.broadcast %51 : vector<16x1xf32> to vector<16x128xf32>
    %54 = arith.mulf %53, %52 : vector<16x128xf32>
    %55 = arith.addf %50, %54 : vector<16x128xf32>
    %56 = vector.extract_strided_slice %22 {offsets = [0, 6], sizes = [16, 1], strides = [1, 1]} : vector<16x128xf32> to vector<16x1xf32>
    %57 = vector.extract_strided_slice %0 {offsets = [0, 768], sizes = [16, 128], strides = [1, 1]} : vector<16x1024xf32> to vector<16x128xf32>
    %58 = vector.broadcast %56 : vector<16x1xf32> to vector<16x128xf32>
    %59 = arith.mulf %58, %57 : vector<16x128xf32>
    %60 = arith.addf %55, %59 : vector<16x128xf32>
    %61 = vector.extract_strided_slice %22 {offsets = [0, 7], sizes = [16, 1], strides = [1, 1]} : vector<16x128xf32> to vector<16x1xf32>
    %62 = vector.extract_strided_slice %0 {offsets = [0, 896], sizes = [16, 128], strides = [1, 1]} : vector<16x1024xf32> to vector<16x128xf32>
    %63 = vector.broadcast %61 : vector<16x1xf32> to vector<16x128xf32>
    %64 = arith.mulf %63, %62 : vector<16x128xf32>
    %65 = arith.addf %60, %64 : vector<16x128xf32>
    %66 = tpu.reciprocal %24 : vector<16x1xf32> -> vector<16x1xf32>
    %67 = vector.broadcast %66 : vector<16x1xf32> to vector<16x128xf32>
    %68 = arith.mulf %65, %67 : vector<16x128xf32>
    %c0_14 = arith.constant 0 : index
    %c0_15 = arith.constant 0 : index
    %69 = vector.load %arg6[%c0_14, %c0_15] : memref<16x128xf32, #tpu.memory_space<vmem>>, vector<16x128xf32>
    tpu.vector_store %arg6[%c0_14, %c0_15], %68 {strides = array<i32>} : memref<16x128xf32, #tpu.memory_space<vmem>>, vector<16x128xf32>,
    return
  }
  func.func @transform_0(%arg0: i32) -> (i32, i32) {
    %c0_i32 = arith.constant 0 : i32
    %c0_i32_0 = arith.constant 0 : i32
    return %arg0, %c0_i32 : i32, i32
  }
  func.func @transform_1(%arg0: i32) -> (i32, i32) {
    %c0_i32 = arith.constant 0 : i32
    %c0_i32_0 = arith.constant 0 : i32
    return %arg0, %c0_i32 : i32, i32
  }
  func.func @transform_2(%arg0: i32) -> (i32, i32) {
    %c0_i32 = arith.constant 0 : i32
    %c0_i32_0 = arith.constant 0 : i32
    %c0_i32_1 = arith.constant 0 : i32
    return %c0_i32, %c0_i32_0 : i32, i32
  }
  func.func @transform_3(%arg0: i32) -> (i32, i32) {
    %c0_i32 = arith.constant 0 : i32
    %c0_i32_0 = arith.constant 0 : i32
    %c0_i32_1 = arith.constant 0 : i32
    return %c0_i32, %c0_i32_0 : i32, i32
  }
  func.func @transform_4(%arg0: i32) -> (i32, i32) {
    %c0_i32 = arith.constant 0 : i32
    %c0_i32_0 = arith.constant 0 : i32
    %c0_i32_1 = arith.constant 0 : i32
    return %c0_i32, %c0_i32_0 : i32, i32
  }
  func.func @transform_5(%arg0: i32) -> (i32, i32) {
    %c0_i32 = arith.constant 0 : i32
    %c0_i32_0 = arith.constant 0 : i32
    return %arg0, %c0_i32 : i32, i32
  }
}

</mosaic_0001>

<bundles_post_ra>
// kernel: tpu_custom_call.1
= control target key start
LH: loop header
LB: loop body
LE: loop exit
PB: predicated region body
PF: predicated region fallthrough
CT: control target
= control target key end

     0   :  { %s2484_s0 = inlined_call_operand.hbm [shape: f32[20,128], index: 0, kind: input, shape index: {}]   ;;  %s2485_s1 = inlined_call_operand.hbm [shape: f32[20,1024], index: 1, kind: input, shape index: {}]   ;;  %s2486_s2 = inlined_call_operand.hbm [shape: f32[8,128], index: 2, kind: input, shape index: {}]   ;;  %s2487_s3 = inlined_call_operand.hbm [shape: bf16[1024,128], index: 3, kind: input, shape index: {}]   ;;  %s2488_s4 = inlined_call_operand.hbm [shape: f32[8,128], index: 4, kind: input, shape index: {}]   ;;  %s2489_s5 = inlined_call_operand.hbm [shape: f32[20,128], index: 5, kind: output, shape index: {}]  }
   0x1   :  { %2493 = sst [smem:[#allocation18_spill]] %s2487_s3 }
   0x2   :  { %10 = vsyncpa [#allocation3], 0 }
   0x3   :  { %12 = vsyncpa [#allocation3 + $0x1], 0 }
   0x4   :  { %13 = vsyncpa [#allocation6], 0 }
   0x5   :  { %15 = vsyncpa [#allocation6 + $0x1], 0 }
   0x6   :  { %16 = vsyncpa [#allocation9], 0 }
   0x7   :  { %17 = vsyncpa [#allocation4], 0 }
   0x8   :  { %19 = vsyncpa [#allocation4 + $0x1], 0  ;;  %s2119_s18 = smov 0   ;;  %s2121_s19 = smov 0  }
   0x9   :  { %s2123_s20 = smov 0   ;;  %s2125_s21 = smov 0  }
   0xa LB: > { %s2140_s22 = sadd.s32 4294967295, %s2065_s21   ;;  %s1331_s23 = sadd.s32 4294967294, %s2065_s21   ;;  %s2065_s21 = sphi %s2125_s21, %s2517_s21   ;;  %s2061_s20 = sphi %s2123_s20, %s2516_s20   ;;  %s2057_s19 = sphi %s2121_s19, %s2515_s19   ;;  %s2053_s18 = sphi %s2119_s18, %s2514_s18  }
   0xb   : > { %s2144_s24 = sadd.s32 1, %s2065_s21   ;;  %s32_s25 = sadd.s32 1, %s2061_s20 }
   0xc   : > { %s29_s26 = ssub.s32 %s2065_s21, %s2144_s24  ;;  %p39_p0 = scmp.ne.s32.totalorder %s2061_s20, %s2057_s19 }
   0xd   : > { %p30_p1 = scmp.eq.s32.totalorder %s29_s26, 0  ;;  %p40_p2 = scmp.eq.s32.totalorder %s2065_s21, 0 }
   0xe   : > { %p45_p3 = scmp.ne.s32.totalorder %s2057_s19, %s2053_s18  ;;  %p2492_p4 = scmp.eq.s32.totalorder %s2140_s22, 0 }
   0xf   : > { %s2156_s27 = scalar_select %p30_p1, %s2061_s20, %s32_s25  }
  0x10   : > { %p2158_p5 = por %p40_p2, %p39_p0  ;;  %p2164_p6 = por %p2492_p4, %p45_p3 }
  0x11   : > { %2494 = sst [smem:[#allocation17_spill]] %s2156_s27  ;;  %p158_p7 = scmp.eq.s32.totalorder %s2140_s22, 1 }
  0x12   : > { %p164_p8 = scmp.eq.s32.totalorder %s1331_s23, 1  ;;  %p1332_p9 = scmp.ge.s32.totalorder %s2065_s21, 1 }
  0x13   : > { %p171_p10 = scmp.lt.s32.totalorder %s2065_s21, 3  ;;  %p2171_p11 = por %p158_p7, %p39_p0 }
  0x14   : > { %p2175_p12 = por %p164_p8, %p45_p3  ;;  %s2500_s3 = sld [smem:[#allocation18_spill]] }
  0x15   : > { %s2497_s30 = scalar_select %p2171_p11, 1, 0 }
  0x16   : > { %s2498_s6 = scalar_select %p2175_p12, 1, 0 }
  0x17   : > { %p2179_p13 = pnand %p1332_p9, %p171_p10  ;;  %s2067_s11 = smov [#allocation8]  }
  0x18   : > { %s196_s12 = sshll.u32 %s2067_s11, 4  ;;  %s183_s16 = sshll.u32 %s2486_s2, 4  ;;  %s197_s12 = int_to_ptr.vmem [resolvable:$true] %s196_s12  ;;  %s184_s16 = int_to_ptr.hbm [resolvable:$true] %s183_s16 }
  0x19   : > { %p1709_p1 = pneg %p2179_p13  ;;  %s2068_s17 = smov 64  }
  0x1a   : > { %s194_s10 = sshll.u32 %s2500_s3, 4  ;;  %s2069_s23 = smov 4   ;;  %s195_s10 = int_to_ptr.hbm [resolvable:$true] %s194_s10 }
  0x1b   : > { %p2190_p0 = pnand %p1709_p1, %p2492_p4  ;;  %s209_s8 = sshll.u32 %s2488_s4, 4  ;;  %s210_s8 = int_to_ptr.hbm [resolvable:$true] %s209_s8 }
  0x1c   : > { %s2070_s9 = smov [#allocation7]   ;;  %s2071_s3 = smov [#allocation10]  }
  0x1d   : > { %1715 = dma.hbm_to_vmem [thread:$0]  (!%p2190_p0), %s195_s10, 8192, %s197_s12, [#allocation9], %s2068_s17, %s2068_s17, %s2069_s23  }
  0x1e   : > { %s185_s11 = sshll.u32 %s2070_s9, 4  ;;  %s211_s27 = sshll.u32 %s2071_s3, 4  ;;  %s186_s11 = int_to_ptr.vmem [resolvable:$true] %s185_s11  ;;  %s212_s27 = int_to_ptr.vmem [resolvable:$true] %s211_s27 }
  0x1f   : > { %1712 = dma.hbm_to_vmem [thread:$0]  (!%p2190_p0), %s184_s16, 128, %s186_s11, [#allocation6]  }
  0x20   : > { %1718 = dma.hbm_to_vmem [thread:$0]  (!%p2190_p0), %s210_s8, 128, %s212_s27, [#allocation9]  }
  0x21   : > { %p2490_p2 = scmp.ge.s32.totalorder %s2065_s21, 2 }
  0x23   : > { %218 = sbr.rel (%p2490_p2) target bundleno = 113 (0x71), region = 28 }
  0x28   : > { %221 = sbr.rel (!%p2158_p5) target bundleno = 77 (0x4d), region = 32  ;;  %s222_s10 = sand.u32 (%p2158_p5), 1, %s2061_s20  }
  0x29   : > { %s1338_s12 = sshll.u32 (%p2158_p5), %s2065_s21, 1  ;;  %s1337_s14 = sshll.u32 (%p2158_p5), %s222_s10, 4 }
  0x2a   : > { %s228_s15 = ssub.s32 (%p2158_p5), 3, %s1338_s12  ;;  %s2216_s16 = scalar_lea.sflag (%p2158_p5), [#allocation3], %s222_s10 }
  0x2b   : > { %p229_p3 = scmp.lt.s32.totalorder (%p2158_p5), %s228_s15, 2  ;;  %s226_s17 = scalar_lea.vmem (%p2158_p5), [#allocation2], %s1337_s14 }
  0x2d   : > { %s2519_s15 = smov (!%p229_p3, %s228_s15), 2 }
  0x2e   : > { %s1339_s3 = sshll.u32 %s2519_s15, 3 }
  0x2f   : > { %s232_s27 = ssub.s32 16, %s1339_s3 }
  0x30   : > { %s233_s13 = sshll.u32 %s232_s27, 4 }
  0x31   : > { %234 = vsyncadd %s2216_s16, %s233_s13  ;;  %p2219_p7 = scmp.ne.s32.totalorder %s1339_s3, 0  ;;  %s1625_s25 = sshll.u32 %s2065_s21, 4 }
  0x32   : > { %s237_s9 = scalar_lea.hbm %s2484_s0, %s1625_s25  ;;  %s2227_s11 = sshll.u32 %s226_s17, 4  ;;  %s242_s11 = int_to_ptr.vmem [resolvable:$true] %s2227_s11 }
  0x33   : > { %s239_s10 = sshll.u32 %s237_s9, 4  ;;  %s2491_s12 = sshll.u32 %s2519_s15, 7  ;;  %s2230_s10 = int_to_ptr.hbm [resolvable:$true] %s239_s10 }
  0x34   : > { %s1898_s14 = sshra.s32 %s2230_s10, 4  ;;  %s1900_s3 = sshrl.u32 %s2491_s12, 4  ;;  %s1899_s14 = int_to_ptr.hbm [resolvable:$true] %s1898_s14 }
  0x35   : > { %s1905_s27 = scalar_lea.hbm %s1899_s14, %s1900_s3  ;;  %s1909_s17 = scalar_lea.hbm %s2484_s0, 24 }
  0x36   : > { %p1906_p8 = scmp.ne.s32.totalorder %s1899_s14, %s1905_s27  ;;  %p1910_p1 = scmp.lt.s32.totalorder %s1899_s14, %s2484_s0 }
  0x37   : > { %p1911_p0 = scmp.lt.s32.totalorder %s1909_s17, %s1905_s27 }
  0x38   : > { %p1907_p9 = pnand %p1906_p8, %p2219_p7 }
  0x39   : > { %p1912_p3 = por %p1911_p0, %p1910_p1 }
  0x3a   : > { %p1908_p10 = pneg %p1907_p9 }
  0x3c   : > { %p1913_p2 = pnand %p1912_p3, %p1908_p10 }
  0x3e   : > { %1916 = shalt.err (!%p1913_p2)
}
  0x3f   : > { %s1917_s9 = sshra.s32 %s242_s11, 4  ;;  %s2072_s13 = smov [#allocation2]   ;;  %s1918_s9 = int_to_ptr.vmem [resolvable:$true] %s1917_s9 }
  0x40   : > { %s1924_s12 = scalar_lea.vmem %s1918_s9, %s1900_s3  ;;  %s1928_s25 = scalar_lea.vmem %s2072_s13, 32 }
  0x41   : > { %p1925_p8 = scmp.ne.s32.totalorder %s1918_s9, %s1924_s12  ;;  %p1930_p12 = scmp.lt.s32.totalorder %s1928_s25, %s1924_s12 }
  0x43   : > { %p1926_p9 = pnand %p1925_p8, %p2219_p7 }
  0x45   : > { %p1927_p4 = pneg %p1926_p9 }
  0x47   : > { %p1932_p11 = pnand %p1930_p12, %p1927_p4 }
  0x49   : > { %1935 = shalt.err (!%p1932_p11)
}
  0x4a   : > { %s2073_s14 = smov 128   ;;  %s2074_s27 = smov 8  }
  0x4b   : > { %s2503_s17 = sshll.u32 %s2519_s15, 7 }
  0x4c   : > { %247 = dma.hbm_to_vmem [thread:$0]  (%p2219_p7), %s2230_s10, %s2503_s17, %s242_s11, %s2216_s16, %s2073_s14, %s2073_s14, %s2074_s27  }
  0x4d PF: > { %250 = sbr.rel (!%p2158_p5) target bundleno = 113 (0x71), region = 36  ;;  %s251_s12 = sand.u32 (%p2158_p5), 1, %s2065_s21  }
  0x4e   : > { %s253_s3 = sand.u32 (%p2158_p5), 1, %s2061_s20   ;;  %s1345_s8 = sshll.u32 (%p2158_p5), %s2065_s21, 1 }
  0x4f   : > { %s1344_s26 = sshll.u32 (%p2158_p5), %s253_s3, 7  ;;  %s257_s9 = ssub.s32 (%p2158_p5), 3, %s1345_s8 }
  0x50   : > { %p258_p4 = scmp.lt.s32.totalorder (%p2158_p5), %s257_s9, 2  ;;  %s2264_s16 = scalar_lea.sflag (%p2158_p5), [#allocation6], %s251_s12 }
  0x51   : > { %s255_s28 = scalar_lea.vmem (%p2158_p5), [#allocation5], %s1344_s26 }
  0x52   : > { %s2521_s9 = smov (!%p258_p4, %s257_s9), 2 }
  0x53   : > { %s1626_s23 = sshll.u32 %s2521_s9, 6 }
  0x54   : > { %s262_s13 = ssub.s32 128, %s1626_s23 }
  0x55   : > { %s263_s15 = sshll.u32 %s262_s13, 4 }
  0x56   : > { %264 = vsyncadd %s2264_s16, %s263_s15  ;;  %p2267_p5 = scmp.ne.s32.totalorder %s1626_s23, 0  ;;  %s1628_s10 = sshll.u32 %s2065_s21, 7 }
  0x57   : > { %s268_s27 = scalar_lea.hbm %s2485_s1, %s1628_s10  ;;  %s2275_s17 = sshll.u32 %s255_s28, 4  ;;  %s273_s17 = int_to_ptr.vmem [resolvable:$true] %s2275_s17 }
  0x58   : > { %s270_s12 = sshll.u32 %s268_s27, 4  ;;  %s1352_s3 = sshll.u32 %s2521_s9, 10  ;;  %s2278_s12 = int_to_ptr.hbm [resolvable:$true] %s270_s12 }
  0x59   : > { %s1937_s26 = sshra.s32 %s2278_s12, 4  ;;  %s1939_s8 = sshrl.u32 %s1352_s3, 4  ;;  %s1938_s26 = int_to_ptr.hbm [resolvable:$true] %s1937_s26 }
  0x5a   : > { %s1944_s23 = scalar_lea.hbm %s1938_s26, %s1939_s8  ;;  %s1948_s28 = scalar_lea.hbm %s2485_s1, 192 }
  0x5b   : > { %p1945_p11 = scmp.ne.s32.totalorder %s1938_s26, %s1944_s23  ;;  %p1949_p7 = scmp.lt.s32.totalorder %s1938_s26, %s2485_s1 }
  0x5c   : > { %p1950_p10 = scmp.lt.s32.totalorder %s1948_s28, %s1944_s23 }
  0x5d   : > { %p1946_p12 = pnand %p1945_p11, %p2267_p5 }
  0x5e   : > { %p1951_p1 = por %p1950_p10, %p1949_p7 }
  0x5f   : > { %p1947_p2 = pneg %p1946_p12 }
  0x61   : > { %p1952_p0 = pnand %p1951_p1, %p1947_p2 }
  0x63   : > { %1955 = shalt.err (!%p1952_p0)
}
  0x64   : > { %s1956_s14 = sshra.s32 %s273_s17, 4  ;;  %s2075_s13 = smov [#allocation5]   ;;  %s1957_s14 = int_to_ptr.vmem [resolvable:$true] %s1956_s14 }
  0x65   : > { %s1963_s27 = scalar_lea.vmem %s1957_s14, %s1939_s8  ;;  %s1967_s15 = scalar_lea.vmem %s2075_s13, 256 }
  0x66   : > { %p1964_p3 = scmp.ne.s32.totalorder %s1957_s14, %s1963_s27  ;;  %p1969_p4 = scmp.lt.s32.totalorder %s1967_s15, %s1963_s27 }
  0x68   : > { %p1965_p8 = pnand %p1964_p3, %p2267_p5 }
  0x6a   : > { %p1966_p9 = pneg %p1965_p8 }
  0x6c   : > { %p1971_p11 = pnand %p1969_p4, %p1966_p9 }
  0x6e   : > { %1974 = shalt.err (!%p1971_p11)
}
  0x6f   : > { %s2076_s26 = smov 1024   ;;  %s2077_s23 = smov 64  }
  0x70   : > { %278 = dma.hbm_to_vmem [thread:$0]  (%p2267_p5), %s2278_s12, %s1352_s3, %s273_s17, %s2264_s16, %s2076_s26, %s2076_s26, %s2077_s23  }
  0x71 PF: > { %284 = sbr.rel (%p2179_p13) target bundleno = 717 (0x2cd), region = 40  ;;  %s2307_s8 = sand.u32 (!%p2179_p13), 1, %s2057_s19  }
  0x72   : > { %s1354_s28 = sshll.u32 (!%p2179_p13), %s2307_s8, 4  ;;  %s287_s10 = scalar_lea.sflag (!%p2179_p13), [#allocation3], %s2307_s8 }
  0x73   : > { %s290_s25 = scalar_lea.vmem (!%p2179_p13), [#allocation2], %s1354_s28 }
  0x76   : > { %2032 = dma.done.wait (%p2164_p6), %s287_s10, 256  }
  0x77   : > { %2034 = vsyncadd (%p2164_p6), %s287_s10, 4294967040  ;;  %s296_s7 = sand.u32 1, %s2140_s22   ;;  %s1355_s9 = sshll.u32 %s2307_s8, 7 }
  0x78   : > { %s297_s16 = scalar_lea.sflag [#allocation6], %s296_s7  ;;  %s2319_s11 = scalar_lea.vmem [#allocation5], %s1355_s9 }
  0x79   : > { %2036 = dma.done.wait (%p2164_p6), %s297_s16, 2048  }
  0x7a   : > { %2038 = vsyncadd (%p2164_p6), %s297_s16, 4294965248  ;;  %p2505_p13 = scmp.eq.s32.totalorder %s2140_s22, 0 }
  0x7c   : > { %2040 = dma.done.wait (%p2505_p13), [#allocation6], 128   ;;  %p2506_p5 = pmov %p2505_p13 }
  0x7e   : > { %2042 = vsyncadd (%p2506_p5), [#allocation6], 4294967168  ;;  %p2507_p12 = pmov %p2506_p5 }
  0x7f   : > { %p2508_p2 = pmov %p2506_p5 }
  0x80   : > { %2044 = dma.done.wait (%p2507_p12), [#allocation9], 8320  }
  0x81   : > { %2046 = vsyncadd (%p2508_p2), [#allocation9], 4294958976  ;;  %v380_v0 = vld [vmem:[%s290_s25] sm:$0xff]  ;;  %v1651_v7 = vld [vmem:[#allocation8 + $0xb0] sm:$0xff]  ;;  %s347_s29 = scalar_lea.vmem [#allocation11], %s1354_s28  ;;  %s1185_s17 = scalar_lea.sflag [#allocation4], %s2307_s8 }
  0x82   : > { %v1797_v1 = vld [vmem:[#allocation7] ss:$0 sm:$0xff]  ;;  %v1635_v8 = vld [vmem:[#allocation8 + $0x30] sm:$0xff]  ;;  %v1650_v12 = vld [vmem:[#allocation8 + $0xa8] sm:$0xff]  ;;  %p2509_p6 = scmp.ne.s32.totalorder %s2497_s30, 0 }
  0x83   : > { %v1652_v2 = vld [vmem:[#allocation8 + $0xb8] sm:$0xff]  ;;  %v385_v4 = vmul.f32 %v1797_v1, %v380_v0  ;;  %v1659_v9 = vld [vmem:[#allocation8 + $0xf0] sm:$0xff]  ;;  %v1634_v13 = vld [vmem:[#allocation8 + $0x28] sm:$0xff]  ;;  %s1617_s12 = sshll.u32 (%p2509_p6), %s2140_s22, 1 }
  0x84   : > { %v1636_v3 = vld [vmem:[#allocation8 + $0x38] sm:$0xff]  ;;  %952 = vmatpush.bf16.msra.mxu2 %v1652_v2  ;;  %v381_v10 = vld [vmem:[%s290_s25 + $0x8] sm:$0xff]  ;;  %v1658_v15 = vld [vmem:[#allocation8 + $0xe8] sm:$0xff]  ;;  %s1193_s3 = ssub.s32 (%p2509_p6), 3, %s1617_s12 }
  0x85   : > { %v1660_v5 = vld [vmem:[#allocation8 + $0xf8] sm:$0xff]  ;;  %924 = vmatpush.bf16.msra.mxu0 %v1636_v3  ;;  %387 = vadd.xlane.f32.xlu0 %v385_v4  ;;  %v1643_v11 = vld [vmem:[#allocation8 + $0x70] sm:$0xff]  ;;  %v386_v14 = vmul.f32 %v1797_v1, %v381_v10  ;;  %v1642_v16 = vld [vmem:[#allocation8 + $0x68] sm:$0xff]  ;;  %p1194_p7 = scmp.lt.s32.totalorder (%p2509_p6), %s1193_s3, 2 }
  0x86   : > { %v1644_v6 = vld [vmem:[#allocation8 + $0x78] sm:$0xff]  ;;  %966 = vmatpush.bf16.msra.mxu3 %v1660_v5  ;;  %v1649_v17 = vld [vmem:[#allocation8 + $0xa0] sm:$0xff]  ;;  %v1647_v25 = vld [vmem:[#allocation8 + $0x90] sm:$0xff] }
  0x87   : > { %938 = vmatpush.bf16.msra.mxu1 %v1644_v6  ;;  %v1633_v18 = vld [vmem:[#allocation8 + $0x20] sm:$0xff]  ;;  %v1648_v21 = vld [vmem:[#allocation8 + $0x98] sm:$0xff]  ;;  %v1631_v26 = vld [vmem:[#allocation8 + $0x10] sm:$0xff] }
  0x88   : > { %953 = vmatpush.bf16.msra.mxu2 %v1651_v7  ;;  %v1657_v19 = vld [vmem:[#allocation8 + $0xe0] sm:$0xff]  ;;  %v1632_v22 = vld [vmem:[#allocation8 + $0x18] sm:$0xff]  ;;  %v1655_v27 = vld [vmem:[#allocation8 + $0xd0] sm:$0xff] }
  0x89   : > { %925 = vmatpush.bf16.msra.mxu0 %v1635_v8  ;;  %v1641_v20 = vld [vmem:[#allocation8 + $0x60] sm:$0xff]  ;;  %v1656_v23 = vld [vmem:[#allocation8 + $0xd8] sm:$0xff]  ;;  %v1639_v28 = vld [vmem:[#allocation8 + $0x50] sm:$0xff] }
  0x8a   : > { %967 = vmatpush.bf16.msra.mxu3 %v1659_v9  ;;  %v1640_v24 = vld [vmem:[#allocation8 + $0x58] sm:$0xff]  ;;  %v1646_v29 = vld [vmem:[#allocation8 + $0x88] sm:$0xff]  ;;  %v1645_v33 = vld [vmem:[#allocation8 + $0x80] sm:$0xff] }
  0x8b   : > { %939 = vmatpush.bf16.msra.mxu1 %v1643_v11  ;;  %v1630_v30 = vld [vmem:[#allocation8 + $0x8] sm:$0xff]  ;;  %v1684_v34 = vld [vmem:[#allocation8 + $0x1b8] sm:$0xff]  ;;  %v1629_v35 = vld [vmem:[#allocation8] sm:$0xff] }
  0x8c   : > { %954 = vmatpush.bf16.msra.mxu2 %v1650_v12  ;;  %v1654_v31 = vld [vmem:[#allocation8 + $0xc8] sm:$0xff]  ;;  %v1653_v36 = vld [vmem:[#allocation8 + $0xc0] sm:$0xff]  ;;  %v1668_v39 = vld [vmem:[#allocation8 + $0x138] sm:$0xff] }
  0x8d   : > { %926 = vmatpush.bf16.msra.mxu0 %v1634_v13  ;;  %389 = vadd.xlane.f32.xlu0 %v386_v14  ;;  %v1638_v32 = vld [vmem:[#allocation8 + $0x48] sm:$0xff]  ;;  %v2340_v40 = vld [vmem:[%s2319_s11] sm:$0xff]  ;;  %v2346_v43 = vld [vmem:[%s2319_s11 + $0x18] sm:$0xff] }
  0x8e   : > { %968 = vmatpush.bf16.msra.mxu3 %v1658_v15  ;;  %v2334_v37 = vld [vmem:[%s2319_s11 + $0x10] sm:$0xff]  ;;  %v2343_v41 = vld [vmem:[%s2319_s11 + $0x40] sm:$0xff]  ;;  %v2349_v44 = vld [vmem:[%s2319_s11 + $0x58] sm:$0xff] }
  0x8f   : > { %940 = vmatpush.bf16.msra.mxu1 %v1642_v16  ;;  %v2337_v38 = vld [vmem:[%s2319_s11 + $0x50] sm:$0xff]  ;;  %v1692_v42 = vld [vmem:[#allocation8 + $0x1f8] sm:$0xff]  ;;  %v1637_v45 = vld [vmem:[#allocation8 + $0x40] sm:$0xff]  ;;  %v394_v48 = vpack.c.bf16 %v2343_v41, %v2340_v40  ;;  %v397_v52 = vpack.c.bf16 %v2349_v44, %v2346_v43 }
  0x90   : > { %955 = vmatpush.bf16.msra.mxu2 %v1649_v17  ;;  %v396_v46 = vpack.c.bf16 %v2337_v38, %v2334_v37  ;;  %v1676_v47 = vld [vmem:[#allocation8 + $0x178] sm:$0xff]  ;;  %v2356_v49 = vld [vmem:[%s2319_s11 + $0x8] sm:$0xff]  ;;  %v1683_v51 = vld [vmem:[#allocation8 + $0x1b0] sm:$0xff] }
  0x91   : > { %927 = vmatpush.bf16.msra.mxu0 %v1633_v18  ;;  %v2359_v50 = vld [vmem:[%s2319_s11 + $0x48] sm:$0xff]  ;;  %v1667_v53 = vld [vmem:[#allocation8 + $0x130] sm:$0xff]  ;;  %v1682_v57 = vld [vmem:[#allocation8 + $0x1a8] sm:$0xff] }
  0x92   : > { %969 = vmatpush.bf16.msra.mxu3 %v1657_v19  ;;  %v1691_v54 = vld [vmem:[#allocation8 + $0x1f0] sm:$0xff]  ;;  %v395_v55 = vpack.c.bf16 %v2359_v50, %v2356_v49  ;;  %v1666_v58 = vld [vmem:[#allocation8 + $0x128] sm:$0xff]  ;;  %v1681_v61 = vld [vmem:[#allocation8 + $0x1a0] sm:$0xff] }
  0x93   : > { %941 = vmatpush.bf16.msra.mxu1 %v1641_v20  ;;  %v1675_v56 = vld [vmem:[#allocation8 + $0x170] sm:$0xff]  ;;  %v1690_v59 = vld [vmem:[#allocation8 + $0x1e8] sm:$0xff]  ;;  %v1665_v62 = vld [vmem:[#allocation8 + $0x120] sm:$0xff] }
  0x94   : > { %956 = vmatpush.bf16.msra.mxu2 %v1648_v21  ;;  %v1674_v60 = vld [vmem:[#allocation8 + $0x168] sm:$0xff]  ;;  %v1689_v63 = vld [vmem:[#allocation8 + $0x1e0] sm:$0xff]  ;;  %v1680_v1 = vld [vmem:[#allocation8 + $0x198] sm:$0xff] }
  0x95   : > { %928 = vmatpush.bf16.msra.mxu0 %v1632_v22  ;;  %v1673_v0 = vld [vmem:[#allocation8 + $0x160] sm:$0xff]  ;;  %v1664_v2 = vld [vmem:[#allocation8 + $0x118] sm:$0xff]  ;;  %v1679_v5 = vld [vmem:[#allocation8 + $0x190] sm:$0xff] }
  0x96   : > { %970 = vmatpush.bf16.msra.mxu3 %v1656_v23  ;;  %v1688_v3 = vld [vmem:[#allocation8 + $0x1d8] sm:$0xff]  ;;  %v1663_v6 = vld [vmem:[#allocation8 + $0x110] sm:$0xff]  ;;  %v1678_v9 = vld [vmem:[#allocation8 + $0x188] sm:$0xff] }
  0x97   : > { %942 = vmatpush.bf16.msra.mxu1 %v1640_v24  ;;  %v1672_v4 = vld [vmem:[#allocation8 + $0x158] sm:$0xff]  ;;  %v1687_v7 = vld [vmem:[#allocation8 + $0x1d0] sm:$0xff]  ;;  %v1662_v10 = vld [vmem:[#allocation8 + $0x108] sm:$0xff] }
  0x98   : > { %957 = vmatpush.bf16.msra.mxu2 %v1647_v25  ;;  %v1671_v8 = vld [vmem:[#allocation8 + $0x150] sm:$0xff]  ;;  %v1686_v11 = vld [vmem:[#allocation8 + $0x1c8] sm:$0xff]  ;;  %v1677_v13 = vld [vmem:[#allocation8 + $0x180] sm:$0xff] }
  0x99   : > { %929 = vmatpush.bf16.msra.mxu0 %v1631_v26  ;;  %v1670_v12 = vld [vmem:[#allocation8 + $0x148] sm:$0xff]  ;;  %v1661_v14 = vld [vmem:[#allocation8 + $0x100] sm:$0xff]  ;;  %v2372_v18 = vld [vmem:[%s2319_s11 + $0x20] sm:$0xff] }
  0x9a   : > { %971 = vmatpush.bf16.msra.mxu3 %v1655_v27  ;;  %v1685_v15 = vld [vmem:[#allocation8 + $0x1c0] sm:$0xff]  ;;  %v2366_v16 = vld [vmem:[%s2319_s11 + $0x30] sm:$0xff]  ;;  %v2375_v19 = vld [vmem:[%s2319_s11 + $0x60] sm:$0xff] }
  0x9b   : > { %943 = vmatpush.bf16.msra.mxu1 %v1639_v28  ;;  %v2369_v17 = vld [vmem:[%s2319_s11 + $0x70] sm:$0xff]  ;;  %v2378_v20 = vld [vmem:[%s2319_s11 + $0x38] sm:$0xff]  ;;  %v1669_v23 = vld [vmem:[#allocation8 + $0x140] sm:$0xff]  ;;  %v398_v26 = vpack.c.bf16 %v2375_v19, %v2372_v18 }
  0x9c   : > { %958 = vmatpush.bf16.msra.mxu2 %v1646_v29  ;;  %v2381_v21 = vld [vmem:[%s2319_s11 + $0x78] sm:$0xff]  ;;  %v400_v22 = vpack.c.bf16 %v2369_v17, %v2366_v16  ;;  %v2386_v24 = vld [vmem:[%s2319_s11 + $0x28] sm:$0xff]  ;;  %v2078_v29 = vmov 0  }
  0x9d   : > { %930 = vmatpush.bf16.msra.mxu0 %v1630_v30  ;;  %v2389_v25 = vld [vmem:[%s2319_s11 + $0x68] sm:$0xff]  ;;  %v401_v27 = vpack.c.bf16 %v2381_v21, %v2378_v20  ;;  %1781 = vset.pattern.permute.xlu1 %v2078_v29  ;;  %v1798_v30 = vld [vmem:[#allocation7 + $0x1] ss:$0 sm:$0xff] }
  0x9e   : > { %972 = vmatpush.bf16.msra.mxu3 %v1654_v31  ;;  %v399_v28 = vpack.c.bf16 %v2389_v25, %v2386_v24  ;;  %1782 = vset.pattern.permute.xlu2 %v2078_v29 }
  0x9f   : > { %944 = vmatpush.bf16.msra.mxu1 %v1638_v32  ;;  %1783 = vset.pattern.permute.xlu0 %v2078_v29 }
  0xa0   : > { %959 = vmatpush.bf16.msra.mxu2 %v1645_v33 }
  0xa1   : > { %931 = vmatpush.bf16.msra.mxu0 %v1629_v35 }
  0xa2   : > { %973 = vmatpush.bf16.msra.mxu3 %v1653_v36 }
  0xa3   : > { %945 = vmatpush.bf16.msra.mxu1 %v1637_v45  ;;  %960 = vmatmul.bf16.vlgmr.msra.gmra.mxu2 %v396_v46 }
  0xa4   : > { %1008 = vmatpush.bf16.msrb.mxu2 %v1684_v34  ;;  %932 = vmatmul.bf16.vlgmr.msra.gmra.mxu0 %v394_v48 }
  0xa5   : > { %980 = vmatpush.bf16.msrb.mxu0 %v1668_v39  ;;  %974 = vmatmul.bf16.vlgmr.msra.gmra.mxu3 %v397_v52 }
  0xa6   : > { %1022 = vmatpush.bf16.msrb.mxu3 %v1692_v42  ;;  %946 = vmatmul.bf16.vlgmr.msra.gmra.mxu1 %v395_v55 }
  0xa7   : > { %994 = vmatpush.bf16.msrb.mxu1 %v1676_v47 }
  0xa8   : > { %1009 = vmatpush.bf16.msrb.mxu2 %v1683_v51 }
  0xa9   : > { %981 = vmatpush.bf16.msrb.mxu0 %v1667_v53 }
  0xaa   : > { %1023 = vmatpush.bf16.msrb.mxu3 %v1691_v54 }
  0xab   : > { %995 = vmatpush.bf16.msrb.mxu1 %v1675_v56 }
  0xac   : > { %1010 = vmatpush.bf16.msrb.mxu2 %v1682_v57 }
  0xad   : > { %982 = vmatpush.bf16.msrb.mxu0 %v1666_v58 }
  0xae   : > { %1024 = vmatpush.bf16.msrb.mxu3 %v1690_v59 }
  0xaf   : > { %996 = vmatpush.bf16.msrb.mxu1 %v1674_v60 }
  0xb0   : > { %1011 = vmatpush.bf16.msrb.mxu2 %v1681_v61 }
  0xb1   : > { %983 = vmatpush.bf16.msrb.mxu0 %v1665_v62 }
  0xb2   : > { %1025 = vmatpush.bf16.msrb.mxu3 %v1689_v63 }
  0xb3   : > { %997 = vmatpush.bf16.msrb.mxu1 %v1673_v0 }
  0xb4   : > { %1012 = vmatpush.bf16.msrb.mxu2 %v1680_v1 }
  0xb5   : > { %984 = vmatpush.bf16.msrb.mxu0 %v1664_v2 }
  0xb6   : > { %1026 = vmatpush.bf16.msrb.mxu3 %v1688_v3  ;;  %v1799_v3 = vld [vmem:[#allocation10] ss:$0 sm:$0xff] }
  0xb7   : > { %998 = vmatpush.bf16.msrb.mxu1 %v1672_v4 }
  0xb8   : > { %1013 = vmatpush.bf16.msrb.mxu2 %v1679_v5 }
  0xb9   : > { %985 = vmatpush.bf16.msrb.mxu0 %v1663_v6 }
  0xba   : > { %1027 = vmatpush.bf16.msrb.mxu3 %v1687_v7 }
  0xbb   : > { %999 = vmatpush.bf16.msrb.mxu1 %v1671_v8 }
  0xbc   : > { %1014 = vmatpush.bf16.msrb.mxu2 %v1678_v9 }
  0xbd   : > { %986 = vmatpush.bf16.msrb.mxu0 %v1662_v10 }
  0xbe   : > { %1028 = vmatpush.bf16.msrb.mxu3 %v1686_v11 }
  0xbf   : > { %1000 = vmatpush.bf16.msrb.mxu1 %v1670_v12 }
  0xc0   : > { %1015 = vmatpush.bf16.msrb.mxu2 %v1677_v13 }
  0xc1   : > { %987 = vmatpush.bf16.msrb.mxu0 %v1661_v14 }
  0xc2   : > { %1029 = vmatpush.bf16.msrb.mxu3 %v1685_v15 }
  0xc3   : > { %1016 = vmatmul.bf16.vlgmr.msrb.gmra.mxu2 %v400_v22  ;;  %1001 = vmatpush.bf16.msrb.mxu1 %v1669_v23 }
  0xc4   : > { %988 = vmatmul.bf16.vlgmr.msrb.gmra.mxu0 %v398_v26  ;;  %v2079_v26 = vmov 2  }
  0xc5   : > { %1030 = vmatmul.bf16.vlgmr.msrb.gmra.mxu3 %v401_v27 }
  0xc6   : > { %1002 = vmatmul.bf16.vlgmr.msrb.gmra.mxu1 %v399_v28 }
  0xf8   : > { %v388_v31 = vpop.xlane.xlu0 %387 }
  0xf9   : > { %v392_v32 = vadd.f32 %v1798_v30, %v388_v31 }
  0xfb   : > { %532 = vperm.xlu1 %1781, %v392_v32  }
 0x100   : > { %v390_v33 = vpop.xlane.xlu0 %389 }
 0x101   : > { %v393_v34 = vadd.f32 %v1798_v30, %v390_v33  ;;  %v2080_v33 = vmov 1  }
 0x103   : > { %537 = vperm.xlu1 %1781, %v393_v34   ;;  %v2081_v34 = vmov 3  }
 0x10b   : > { %1786 = vset.pattern.permute.xlu1 %v2079_v26 }
 0x121   : > { %v933_v35 = vpop.f32.mrf.mxu0 }
 0x123   : > { %v947_v36 = vpop.f32.mrf.mxu1 }
 0x126   : > { %v961_v39 = vpop.f32.mrf.mxu2 }
 0x128   : > { %v975_v42 = vpop.f32.mrf.mxu3 }
 0x129   : > { %v935_v45 = vpop.f32.mrf.mxu0 }
 0x12b   : > { %v949_v46 = vpop.f32.mrf.mxu1 }
 0x12e   : > { %v963_v47 = vpop.f32.mrf.mxu2 }
 0x130   : > { %v977_v52 = vpop.f32.mrf.mxu3 }
 0x141   : > { %v989_v55 = vpop.f32.mrf.mxu0 }
 0x143   : > { %v1003_v57 = vpop.f32.mrf.mxu1 }
 0x146   : > { %v1017_v61 = vpop.f32.mrf.mxu2 }
 0x148   : > { %v1031_v0 = vpop.f32.mrf.mxu3 }
 0x149   : > { %v991_v6 = vpop.f32.mrf.mxu0 }
 0x14b   : > { %v1005_v9 = vpop.f32.mrf.mxu1 }
 0x14e   : > { %v1019_v11 = vpop.f32.mrf.mxu2 }
 0x150   : > { %v1033_v13 = vpop.f32.mrf.mxu3 }
 0x16d   : > { %v533_v48 = vpop.permute.xlu1 %532 }
 0x16e   : > { %v934_v51 = vadd.f32 %v933_v35, %v533_v48  ;;  %v2082_v35 = vmov 4  }
 0x170   : > { %v948_v53 = vadd.f32 %v947_v36, %v934_v51  ;;  %v2083_v36 = vmov 5  }
 0x172   : > { %v962_v54 = vadd.f32 %v961_v39, %v948_v53  ;;  %v2084_v39 = vmov 7  }
 0x174   : > { %v976_v56 = vadd.f32 %v975_v42, %v962_v54  ;;  %v2085_v42 = vmov 6  }
 0x175   : > { %v538_v58 = vpop.permute.xlu1 %537 }
 0x176   : > { %v990_v59 = vadd.f32 %v989_v55, %v976_v56  ;;  %v936_v60 = vadd.f32 %v935_v45, %v538_v58 }
 0x178   : > { %v1004_v62 = vadd.f32 %v1003_v57, %v990_v59  ;;  %v950_v63 = vadd.f32 %v949_v46, %v936_v60 }
 0x17a   : > { %v1018_v1 = vadd.f32 %v1017_v61, %v1004_v62  ;;  %v964_v2 = vadd.f32 %v963_v47, %v950_v63 }
 0x17c   : > { %v1032_v4 = vadd.f32 %v1031_v0, %v1018_v1  ;;  %v978_v5 = vadd.f32 %v977_v52, %v964_v2 }
 0x17e   : > { %v992_v7 = vadd.f32 %v991_v6, %v978_v5  ;;  %v1038_v8 = vadd.f32 %v1799_v3, %v1032_v4 }
 0x180   : > { %v1006_v10 = vadd.f32 %v1005_v9, %v992_v7  ;;  %1040 = vmax.xlane.f32.xlu2 %v1038_v8 }
 0x182   : > { %v1020_v12 = vadd.f32 %v1019_v11, %v1006_v10 }
 0x184   : > { %v1034_v14 = vadd.f32 %v1033_v13, %v1020_v12 }
 0x186   : > { %v1039_v15 = vadd.f32 %v1799_v3, %v1034_v14 }
 0x188   : > { %1042 = vmax.xlane.f32.xlu2 %v1039_v15 }
 0x1f3   : > { %v1041_v22 = vpop.xlane.xlu2 %1040 }
 0x1f4   : > { %v1044_v23 = vsub.f32 %v1038_v8, %v1041_v22 }
 0x1f6   : > { %v1046_v27 = vmul.f32 1.442695, %v1044_v23 }
 0x1f8   : > { %1800 = vpow2.f32 %v1046_v27 }
 0x1fb   : > { %v1043_v28 = vpop.xlane.xlu2 %1042 }
 0x1fc   : > { %v1045_v29 = vsub.f32 %v1039_v15, %v1043_v28 }
 0x1fe   : > { %v1801_v30 = vpop.eup %1800  ;;  %v1048_v31 = vmul.f32 1.442695, %v1045_v29 }
 0x1ff   : > { %1056 = vperm.xlu2 %1782, %v1801_v30   ;;  %1050 = vadd.xlane.f32.xlu0 %v1801_v30 }
 0x200   : > { %1802 = vpow2.f32 %v1048_v31 }
 0x206   : > { %v1803_v32 = vpop.eup %1802 }
 0x207   : > { %1784 = vset.pattern.permute.xlu2 %v2080_v33  ;;  %1052 = vadd.xlane.f32.xlu1 %v1803_v32 }
 0x208   : > { %1069 = vperm.xlu2 %1784, %v1801_v30  }
 0x210   : > { %1073 = vperm.xlu2 %1784, %v1803_v32  }
 0x213   : > { %1061 = vperm.xlu0 %1783, %v1803_v32  }
 0x218   : > { %1785 = vset.pattern.permute.xlu2 %v2079_v26 }
 0x219   : > { %1081 = vperm.xlu2 %1785, %v1801_v30  }
 0x21b   : > { %1787 = vset.pattern.permute.xlu0 %v2081_v34 }
 0x21c   : > { %1093 = vperm.xlu0 %1787, %v1801_v30  }
 0x220   : > { %1085 = vperm.xlu1 %1786, %v1803_v32  }
 0x221   : > { %1788 = vset.pattern.permute.xlu2 %v2081_v34 }
 0x222   : > { %1097 = vperm.xlu2 %1788, %v1803_v32  }
 0x224   : > { %1790 = vset.pattern.permute.xlu0 %v2082_v35 }
 0x225   : > { %1109 = vperm.xlu0 %1790, %v1803_v32  }
 0x228   : > { %1792 = vset.pattern.permute.xlu1 %v2083_v36 }
 0x229   : > { %1121 = vperm.xlu1 %1792, %v1803_v32  }
 0x22a   : > { %1789 = vset.pattern.permute.xlu2 %v2082_v35 }
 0x22b   : > { %1105 = vperm.xlu2 %1789, %v1801_v30  }
 0x22d   : > { %1795 = vset.pattern.permute.xlu0 %v2084_v39 }
 0x22e   : > { %1141 = vperm.xlu0 %1795, %v1801_v30  }
 0x231   : > { %1794 = vset.pattern.permute.xlu1 %v2085_v42 }
 0x232   : > { %1133 = vperm.xlu1 %1794, %v1803_v32  }
 0x233   : > { %1791 = vset.pattern.permute.xlu2 %v2083_v36 }
 0x234   : > { %1117 = vperm.xlu2 %1791, %v1801_v30  }
 0x23c   : > { %1793 = vset.pattern.permute.xlu2 %v2085_v42 }
 0x23d   : > { %1129 = vperm.xlu2 %1793, %v1801_v30  }
 0x245   : > { %1796 = vset.pattern.permute.xlu2 %v2084_v39 }
 0x246   : > { %1145 = vperm.xlu2 %1796, %v1803_v32  }
 0x259   : > { %v1057_v45 = vpop.permute.xlu2 %1056 }
 0x25a   : > { %v1064_v60 = vmul.f32 %v1057_v45, %v2340_v40 }
 0x262   : > { %v1070_v46 = vpop.permute.xlu2 %1069 }
 0x263   : > { %v1076_v58 = vmul.f32 %v1070_v46, %v2356_v49 }
 0x265   : > { %v1078_v0 = vadd.f32 %v1076_v58, %v1064_v60 }
 0x26a   : > { %v1074_v47 = vpop.permute.xlu2 %1073 }
 0x26b   : > { %v1077_v6 = vmul.f32 %v1074_v47, %v2359_v50 }
 0x272   : > { %v1051_v52 = vpop.xlane.xlu0 %1050 }
 0x273   : > { %v1082_v48 = vpop.permute.xlu2 %1081  ;;  %1804 = vrcp.f32 %v1051_v52  ;;  %vm1157_vm1 = vweird.f32 %v1051_v52  ;;  %v1161_v23 = vand.u32 2147483647, %v1051_v52 }
 0x274   : > { %v1088_v62 = vmul.f32 %v1082_v48, %v2334_v37 }
 0x275   : > { %vm1162_vm3 = vcmp.eq.f32.partialorder %v1161_v23, 8.507059e+37 }
 0x276   : > { %v1090_v4 = vadd.f32 %v1088_v62, %v1078_v0 }
 0x279   : > { %v1805_v56 = vpop.eup %1804 }
 0x27a   : > { %v2397_v55 = vpop.xlane.xlu1 %1052  ;;  %v1153_v61 = vmul.f32 %v1805_v56, %v1051_v52  ;;  %vm1158_vm0 = vweird.f32 %v1805_v56 }
 0x27b   : > { %1806 = vrcp.f32 %v2397_v55  ;;  %vm1159_vm2 = vmor %vm1157_vm1, %vm1158_vm0  ;;  %vm1171_vm5 = vweird.f32 %v2397_v55  ;;  %v1177_v35 = vand.u32 2147483648, %v2397_v55  ;;  %v1175_v42 = vand.u32 2147483647, %v2397_v55 }
 0x27c   : > { %v1098_v51 = vpop.permute.xlu2 %1097  ;;  %v1154_v3 = vsub.f32 1.0, %v1153_v61 }
 0x27d   : > { %vm1176_vm7 = vcmp.eq.f32.partialorder %v1175_v42, 8.507059e+37 }
 0x27e   : > { %v1155_v9 = vmul.f32 %v1805_v56, %v1154_v3 }
 0x280   : > { %v1156_v22 = vadd.f32 %v1805_v56, %v1155_v9 }
 0x281   : > { %v1807_v2 = vpop.eup %1806 }
 0x282   : > { %v1167_v7 = vmul.f32 %v1807_v2, %v2397_v55  ;;  %v1160_v32 = vsel %vm1159_vm2, %v1805_v56, %v1156_v22  ;;  %vm1172_vm4 = vweird.f32 %v1807_v2 }
 0x283   : > { %vm1173_vm6 = vmor %vm1171_vm5, %vm1172_vm4 }
 0x284   : > { %v1168_v12 = vsub.f32 1.0, %v1167_v7 }
 0x285   : > { %v1062_v53 = vpop.permute.xlu0 %1061  ;;  %v1106_v54 = vpop.permute.xlu2 %1105 }
 0x286   : > { %v1065_v5 = vmul.f32 %v1062_v53, %v2343_v41  ;;  %v1112_v37 = vmul.f32 %v1106_v54, %v2372_v18  ;;  %v1101_v41 = vmul.f32 %v1098_v51, %v2349_v44  ;;  %v1169_v26 = vmul.f32 %v1807_v2, %v1168_v12 }
 0x287   : > { %v1178_v51 = vor.u32 1.1754944e-38, %v1177_v35 }
 0x288   : > { %v1079_v10 = vadd.f32 %v1077_v6, %v1065_v5 }
 0x28e   : > { %v1094_v57 = vpop.permute.xlu0 %1093  ;;  %v1118_v59 = vpop.permute.xlu2 %1117 }
 0x28f   : > { %v1100_v1 = vmul.f32 %v1094_v57, %v2346_v43  ;;  %v1124_v50 = vmul.f32 %v1118_v59, %v2386_v24 }
 0x291   : > { %v1102_v49 = vadd.f32 %v1100_v1, %v1090_v4 }
 0x292   : > { %v1086_v63 = vpop.permute.xlu1 %1085 }
 0x293   : > { %v1089_v8 = vmul.f32 %v1086_v63, %v2337_v38  ;;  %v1114_v43 = vadd.f32 %v1112_v37, %v1102_v49  ;;  %v1163_v38 = vand.u32 2147483648, %v1051_v52 }
 0x295   : > { %v1091_v13 = vadd.f32 %v1089_v8, %v1079_v10  ;;  %v1126_v27 = vadd.f32 %v1124_v50, %v1114_v43  ;;  %v1164_v24 = vor.u32 1.1754944e-38, %v1163_v38 }
 0x297   : > { %v1110_v40 = vpop.permute.xlu0 %1109  ;;  %v1130_v11 = vpop.permute.xlu2 %1129  ;;  %v1103_v28 = vadd.f32 %v1101_v41, %v1091_v13 }
 0x298   : > { %v1136_v15 = vmul.f32 %v1130_v11, %v2366_v16  ;;  %v1113_v18 = vmul.f32 %v1110_v40, %v2375_v19  ;;  %v1170_v16 = vadd.f32 %v1807_v2, %v1169_v26  ;;  %v1165_v19 = vsel %vm1162_vm3, %v1164_v24, %v1160_v32 }
 0x29a   : > { %v1138_v30 = vadd.f32 %v1136_v15, %v1126_v27  ;;  %v1115_v33 = vadd.f32 %v1113_v18, %v1103_v28  ;;  %v1174_v47 = vsel %vm1173_vm6, %v1807_v2, %v1170_v16 }
 0x29b   : > { %v1122_v14 = vpop.permute.xlu1 %1121  ;;  %v1179_v53 = vsel %vm1176_vm7, %v1178_v51, %v1174_v47 }
 0x29c   : > { %v1125_v31 = vmul.f32 %v1122_v14, %v2389_v25 }
 0x29e   : > { %v1127_v25 = vadd.f32 %v1125_v31, %v1115_v33 }
 0x2a0   : > { %v1142_v29 = vpop.permute.xlu0 %1141  ;;  %v1146_v36 = vpop.permute.xlu2 %1145 }
 0x2a1   : > { %v1148_v44 = vmul.f32 %v1142_v29, %v2378_v20  ;;  %v1149_v46 = vmul.f32 %v1146_v36, %v2381_v21 }
 0x2a3   : > { %v1150_v34 = vadd.f32 %v1148_v44, %v1138_v30 }
 0x2a4   : > { %v1134_v39 = vpop.permute.xlu1 %1133 }
 0x2a5   : > { %v1180_v45 = vmul.f32 %v1165_v19, %v1150_v34  ;;  %v1137_v20 = vmul.f32 %v1134_v39, %v2369_v17 }
 0x2a7   : > { %1182 = vst [vmem:[%s347_s29] sm:$0xff] %v1180_v45  ;;  %v1139_v48 = vadd.f32 %v1137_v20, %v1127_v25 }
 0x2a9   : > { %v1151_v52 = vadd.f32 %v1149_v46, %v1139_v48  ;;  %1191 = sbr.rel (!%p2509_p6) target bundleno = 717 (0x2cd), region = 64 }
 0x2ab   : > { %v1181_v54 = vmul.f32 %v1179_v53, %v1151_v52 }
 0x2ad   : > { %1183 = vst [vmem:[%s347_s29 + $0x8] sm:$0xff] %v1181_v54 }
 0x2ae   : > { %s2523_s3 = smov (!%p1194_p7, %s1193_s3), 2 }
 0x2af   : > { %s1618_s14 = sshll.u32 %s2523_s3, 3 }
 0x2b0   : > { %s1197_s27 = ssub.s32 16, %s1618_s14 }
 0x2b1   : > { %s1198_s13 = sshll.u32 %s1197_s27, 4 }
 0x2b2   : > { %1199 = vsyncadd %s1185_s17, %s1198_s13  ;;  %p2431_p10 = scmp.ne.s32.totalorder %s1618_s14, 0  ;;  %s1693_s30 = sshll.u32 %s2140_s22, 4 }
 0x2b3   : > { %s1202_s28 = scalar_lea.hbm %s2489_s5, %s1693_s30  ;;  %s1204_s10 = sshll.u32 %s347_s29, 4  ;;  %s2439_s10 = int_to_ptr.vmem [resolvable:$true] %s1204_s10 }
 0x2b4   : > { %s1206_s25 = sshll.u32 %s1202_s28, 4  ;;  %s1622_s7 = sshll.u32 %s2523_s3, 7  ;;  %s2441_s25 = int_to_ptr.hbm [resolvable:$true] %s1206_s25 }
 0x2b5   : > { %s1976_s9 = sshra.s32 %s2439_s10, 4  ;;  %s1978_s16 = sshrl.u32 %s1622_s7, 4  ;;  %s1977_s9 = int_to_ptr.vmem [resolvable:$true] %s1976_s9 }
 0x2b6   : > { %s1983_s11 = scalar_lea.vmem %s1977_s9, %s1978_s16  ;;  %s2086_s22 = smov [#allocation11]  }
 0x2b7   : > { %p1984_p1 = scmp.ne.s32.totalorder %s1977_s9, %s1983_s11  ;;  %s1987_s12 = scalar_lea.vmem %s2086_s22, 32 }
 0x2b8   : > { %p1989_p8 = scmp.lt.s32.totalorder %s1987_s12, %s1983_s11 }
 0x2b9   : > { %p1985_p0 = pnand %p1984_p1, %p2431_p10 }
 0x2bb   : > { %p1986_p3 = pneg %p1985_p0 }
 0x2bd   : > { %p1991_p9 = pnand %p1989_p8, %p1986_p3 }
 0x2bf   : > { %1994 = shalt.err (!%p1991_p9)
}
 0x2c0   : > { %s1995_s29 = sshra.s32 %s2441_s25, 4  ;;  %s2006_s30 = scalar_lea.hbm %s2489_s5, 24  ;;  %s1996_s29 = int_to_ptr.hbm [resolvable:$true] %s1995_s29 }
 0x2c1   : > { %s2002_s14 = scalar_lea.hbm %s1996_s29, %s1978_s16  ;;  %p2007_p5 = scmp.lt.s32.totalorder %s1996_s29, %s2489_s5 }
 0x2c2   : > { %p2003_p4 = scmp.ne.s32.totalorder %s1996_s29, %s2002_s14  ;;  %p2008_p12 = scmp.lt.s32.totalorder %s2006_s30, %s2002_s14 }
 0x2c4   : > { %p2004_p11 = pnand %p2003_p4, %p2431_p10  ;;  %p2009_p2 = por %p2008_p12, %p2007_p5 }
 0x2c6   : > { %p2005_p13 = pneg %p2004_p11 }
 0x2c8   : > { %p2010_p6 = pnand %p2009_p2, %p2005_p13 }
 0x2ca   : > { %2013 = shalt.err (!%p2010_p6)
}
 0x2cb   : > { %s2087_s28 = smov 128   ;;  %s2088_s9 = smov 8  }
 0x2cc   : > { %1212 = dma.vmem_to_hbm [thread:$0]  (%p2431_p10), %s2439_s10, %s1622_s7, %s2441_s25, %s1185_s17, %s2087_s28, %s2087_s28, %s2088_s9  }
 0x2cd PF: > { %s1221_s16 = sand.u32 1, %s2053_s18   ;;  %p2511_p7 = scmp.ne.s32.totalorder %s2498_s6, 0 }
 0x2ce   : > { %p2512_p1 = scmp.ge.s32.totalorder %s2065_s21, 2  ;;  %s1222_s11 = scalar_lea.sflag [#allocation4], %s1221_s16 }
 0x2d0   : > { %p1720_p0 = pnand %p2512_p1, %p2511_p7 }
 0x2d2   : > { %p1721_p3 = pneg %p1720_p0 }
 0x2d4   : > { %2048 = dma.done.wait (%p1721_p3), %s1222_s11, 256  }
 0x2d5   : > { %2050 = vsyncadd (%p1721_p3), %s1222_s11, 4294967040  ;;  %s2513_s15 = sld [smem:[#allocation17_spill]]  ;;  %p22_p8 = scmp.ge.s32.totalorder %s2144_s24, 4  }
 0x2d6   : > { %s2514_s18 = smov %s2057_s19  ;;  %s2515_s19 = smov %s2061_s20 }
 0x2d7   : > { %s2517_s21 = smov %s2144_s24  ;;  %24 = sbr.rel (!%p22_p8) target bundleno = 10 (0xa), region = 110 }
 0x2db   : > { %s2516_s20 = smov %s2513_s15 }
 0x2dc   :  { %1228 = vsyncpa [#allocation3], 1 }
 0x2dd   :  { %1230 = vsyncpa [#allocation3 + $0x1], 1 }
 0x2de   :  { %1231 = vsyncpa [#allocation6], 1 }
 0x2df   :  { %1233 = vsyncpa [#allocation6 + $0x1], 1 }
 0x2e0   :  { %1234 = vsyncpa [#allocation9], 1 }
 0x2e1   :  { %1235 = vsyncpa [#allocation4], 1 }
 0x2e2   :  { %1237 = vsyncpa [#allocation4 + $0x1], 1 }

</bundles_post_ra>
